<compile_context>
chip_gen: v6e
topology: v6e:2x2x1
jax: 0.10.0
libtpu: 0.0.40
codegen_flags: <defaults>
</compile_context>

<pallas_src>
import functools

import jax
import jax.numpy as jnp
from jax import lax
from jax.experimental import pallas as pl
from jax.experimental.pallas import tpu as pltpu


def _resblock_kernel(x_ref, w1_ref, w2_ref, b_ref, mask_ref, o_ref,
                     xpad_ref, hpad_ref, patch_ref, *,
                     C, KH, KW, Wp, span, Lflat, head):
    """One batch image per grid step, everything resident in VMEM.

    x_ref     : (1, C, span)     f32   input in flat-window layout
                                       (each row = [W valid values, 2P zeros])
    w*_ref    : (C, KH*KW*C)     bf16  im2col weights, tap-major (kh, kw, ci)
    b_ref     : (C, 2)           f32   [b1, b2]
    mask_ref  : (2, span)        f32   row 0: 1.0 on valid cols / 0.0 on pad cols
                                       row 1: mask * res_scale (pre-folded)
    o_ref     : (1, C, span)     f32   output, flat-window layout, pad cols = 0
    xpad_ref  : (C, Lflat)       bf16  zero-padded input, flattened spatially
    hpad_ref  : (C, Lflat)       bf16  zero-padded intermediate activation
    patch_ref : (KH*KW*C, span)  bf16  im2col patches (shared by both convs)
    """
    x = x_ref[0]                                   # (C, span) f32, residual source

    zeros_border = jnp.zeros((C, head), jnp.bfloat16)   # tail length == head (square kernel)

    # ---- rebuild the zero-padded input: 2 tiny border zeros + 1 dense interior store ----
    xpad_ref[:, :head] = zeros_border
    xpad_ref[:, head + span:] = zeros_border
    xpad_ref[:, head:head + span] = x.astype(jnp.bfloat16)

    def conv(src_ref, w_ref):
        # im2col via the "flat window" trick: tap (kh, kw) of the padded image is the
        # contiguous lane slice src[:, kh*Wp+kw : kh*Wp+kw+span] (pure lane shifts).
        # Stack the KH*KW taps as bf16 rows, then ONE MXU matmul per conv:
        #   (C, KH*KW*C) @ (KH*KW*C, span) -> (C, span); bf16 operands, f32 accumulation.
        src = src_ref[...]                         # (C, Lflat) bf16
        t = 0
        for kh in range(KH):
            for kw in range(KW):
                off = kh * Wp + kw
                patch_ref[t * C:(t + 1) * C, :] = src[:, off:off + span]
                t += 1
        return jnp.dot(w_ref[...], patch_ref[...], preferred_element_type=jnp.float32)

    mask = mask_ref[0:1, :]                        # (1, span) valid-column mask
    smask = mask_ref[1:2, :]                       # (1, span) mask * res_scale

    # ---- conv1 -> +bias -> ReLU (f32); mask so pad cols stay zero in hpad ----
    y1 = jnp.maximum(conv(xpad_ref, w1_ref) + b_ref[:, 0:1], 0.0) * mask

    # ---- re-pad the intermediate: 2 tiny border zeros + 1 dense interior store (bf16) ----
    hpad_ref[:, :head] = zeros_border
    hpad_ref[:, head + span:] = zeros_border
    hpad_ref[:, head:head + span] = y1.astype(jnp.bfloat16)

    # ---- conv2 -> +bias; out = body(x) * res_scale + x (f32), pad cols forced to 0 ----
    y2 = conv(hpad_ref, w2_ref) + b_ref[:, 1:2]
    o_ref[0] = (y2 * smask + x).astype(o_ref.dtype)


def resblock_forward(x_nchw, w1_hwio, b1, w2_hwio, b2, res_scale=0.1):
    """x_nchw: (B, C, H, W) f32; w*: (KH, KW, C, C) HWIO; b*: (C,). Returns NCHW."""
    B, C, H, W = x_nchw.shape
    KH, KW, Cin, Cout = w1_hwio.shape
    assert KH == KW and KH % 2 == 1, "square, odd conv kernels only"
    assert Cin == C and Cout == C and w2_hwio.shape == w1_hwio.shape

    P = KH // 2
    Wp = W + 2 * P                           # width of a zero-padded row
    span = H * Wp                            # flat-window length (= in/out slab width)
    Lflat = span + (KH - 1) * Wp + (KW - 1)  # padded-flat length incl. slice overrun tail
    head = P * Wp + P                        # flat offset of interior pixel (P, P)

    # Flat-window input layout: each image row becomes [W valid cols, 2P zeros].
    x_flat = jnp.pad(x_nchw.astype(jnp.float32),
                     ((0, 0), (0, 0), (0, 0), (0, 2 * P))).reshape(B, C, span)
    # im2col weights: (C_out, KH*KW*C_in), tap-major (kh, kw, ci); bf16 for the MXU.
    w1t = jnp.transpose(w1_hwio, (3, 0, 1, 2)).reshape(C, KH * KW * C).astype(jnp.bfloat16)
    w2t = jnp.transpose(w2_hwio, (3, 0, 1, 2)).reshape(C, KH * KW * C).astype(jnp.bfloat16)
    b12 = jnp.stack([b1, b2], axis=1).astype(jnp.float32)          # (C, 2)
    # Row 0: 1.0 on valid columns / 0.0 on width-pad columns; row 1: same, pre-scaled.
    valid = (jnp.arange(span, dtype=jnp.int32) % Wp < W).astype(jnp.float32)
    mask2 = jnp.stack([valid, valid * jnp.float32(res_scale)], axis=0)   # (2, span)

    kernel = functools.partial(_resblock_kernel, C=C, KH=KH, KW=KW, Wp=Wp,
                               span=span, Lflat=Lflat, head=head)
    out_flat = pl.pallas_call(
        kernel,
        out_shape=jax.ShapeDtypeStruct((B, C, span), jnp.float32),
        grid_spec=pltpu.PrefetchScalarGridSpec(
            num_scalar_prefetch=0,
            grid=(B,),   # TODO(synk): (B, H//TH) row strips for large images / v7x 2-TC
            in_specs=[
                pl.BlockSpec((1, C, span), lambda b: (b, 0, 0)),        # x, flat-window (only DMA)
                pl.BlockSpec((C, KH * KW * C), lambda b: (0, 0)),       # w1 (bf16 im2col)
                pl.BlockSpec((C, KH * KW * C), lambda b: (0, 0)),       # w2
                pl.BlockSpec((C, 2), lambda b: (0, 0)),                 # [b1, b2] (f32)
                pl.BlockSpec((2, span), lambda b: (0, 0)),              # [mask, mask*res_scale]
            ],
            out_specs=pl.BlockSpec((1, C, span), lambda b: (b, 0, 0)),  # lane-dense, chain-friendly
            scratch_shapes=[
                pltpu.VMEM((C, Lflat), jnp.bfloat16),           # padded input (flat, bf16)
                pltpu.VMEM((C, Lflat), jnp.bfloat16),           # padded intermediate (flat, bf16)
                pltpu.VMEM((KH * KW * C, span), jnp.bfloat16),  # shared im2col patches (bf16)
            ],
        ),
        compiler_params=pltpu.CompilerParams(
            dimension_semantics=("parallel",),
            vmem_limit_bytes=32 * 1024 * 1024),
    )(x_flat, w1t, w2t, b12, mask2)

    # out_flat is chain-friendly (pad cols already zero); strip the pad columns once -> NCHW.
    return out_flat.reshape(B, C, H, Wp)[:, :, :, :W]


def resblock_reference(x_nchw, w1, b1, w2, b2, res_scale=0.1):
    """Pure-JAX reference with matching numerics (bf16 matmul operands, f32 accum)."""
    q = lambda a: a.astype(jnp.bfloat16).astype(jnp.float32)   # MXU operand quantization
    dn = ('NCHW', 'HWIO', 'NCHW')
    y = lax.conv_general_dilated(q(x_nchw), q(w1), (1, 1), 'SAME', dimension_numbers=dn)
    y = jnp.maximum(y + b1.reshape(1, -1, 1, 1), 0.0)
    y = lax.conv_general_dilated(q(y), q(w2), (1, 1), 'SAME', dimension_numbers=dn)
    y = y + b2.reshape(1, -1, 1, 1)
    return y * res_scale + x_nchw


if __name__ == "__main__":
    B, C, H, W = 2, 4, 16, 16        # NCHW input, n_hidden_ch=4
    K = 3                            # kernel_size=3 (same-padding conv factory)
    res_scale = 0.1

    key = jax.random.PRNGKey(0)
    kx, k1, kb1, k2, kb2 = jax.random.split(key, 5)

    x = jax.random.normal(kx, (B, C, H, W), dtype=jnp.float32)
    w1 = jax.random.normal(k1, (K, K, C, C), dtype=jnp.float32) * 0.1
    b1 = jax.random.normal(kb1, (C,), dtype=jnp.float32) * 0.1
    w2 = jax.random.normal(k2, (K, K, C, C), dtype=jnp.float32) * 0.1
    b2 = jax.random.normal(kb2, (C,), dtype=jnp.float32) * 0.1

    out = resblock_forward(x, w1, b1, w2, b2, res_scale)
    out = jax.block_until_ready(out)

    ref = resblock_reference(x, w1, b1, w2, b2, res_scale)
    assert out.shape == (B, C, H, W)
    err = float(jnp.max(jnp.abs(out - ref)))
    assert jnp.allclose(out, ref, atol=1e-3, rtol=1e-3), err

    print("KERNEL_OK")
</pallas_src>

<mosaic_0001>
module attributes {stable_mosaic.version = 11 : i64} {
  func.func @_resblock_kernel(%arg0: i32, %arg1: memref<1x4x288xf32, #tpu.memory_space<vmem>>, %arg2: memref<4x36xbf16, #tpu.memory_space<vmem>>, %arg3: memref<4x36xbf16, #tpu.memory_space<vmem>>, %arg4: memref<4x2xf32, #tpu.memory_space<vmem>>, %arg5: memref<2x288xf32, #tpu.memory_space<vmem>>, %arg6: memref<1x4x288xf32, #tpu.memory_space<vmem>>, %arg7: memref<4x326xbf16, #tpu.memory_space<vmem>>, %arg8: memref<4x326xbf16, #tpu.memory_space<vmem>>, %arg9: memref<36x288xbf16, #tpu.memory_space<vmem>>) attributes {dimension_semantics = [#tpu.dimension_semantics<parallel>], iteration_bounds = array<i64: 2>, scalar_prefetch = 0 : i64, scratch_operands = 3 : i64, tpu.core_type = #tpu.core_type<tc>, window_params = [{transform_indices = @transform_0, window_bounds = array<i64: 1, 4, 288>}, {pipeline_mode = #tpu.pipeline_mode<synchronous>, transform_indices = @transform_1, window_bounds = array<i64: 4, 36>}, {pipeline_mode = #tpu.pipeline_mode<synchronous>, transform_indices = @transform_2, window_bounds = array<i64: 4, 36>}, {pipeline_mode = #tpu.pipeline_mode<synchronous>, transform_indices = @transform_3, window_bounds = array<i64: 4, 2>}, {pipeline_mode = #tpu.pipeline_mode<synchronous>, transform_indices = @transform_4, window_bounds = array<i64: 2, 288>}, {transform_indices = @transform_5, window_bounds = array<i64: 1, 4, 288>}]} {
    %c0 = arith.constant 0 : index
    %c0_0 = arith.constant 0 : index
    %c0_1 = arith.constant 0 : index
    %0 = vector.load %arg1[%c0, %c0_0, %c0_1] : memref<1x4x288xf32, #tpu.memory_space<vmem>>, vector<1x4x288xf32>
    %1 = vector.shape_cast %0 : vector<1x4x288xf32> to vector<4x288xf32>
    %cst = arith.constant 0.000000e+00 : bf16
    %2 = vector.broadcast %cst : bf16 to vector<4x19xbf16>
    %c0_2 = arith.constant 0 : index
    %c0_3 = arith.constant 0 : index
    %3 = vector.load %arg7[%c0_2, %c0_3] : memref<4x326xbf16, #tpu.memory_space<vmem>>, vector<4x19xbf16>
    tpu.vector_store %arg7[%c0_2, %c0_3], %2 {strides = array<i32>} : memref<4x326xbf16, #tpu.memory_space<vmem>>, vector<4x19xbf16>,
    %c0_4 = arith.constant 0 : index
    %c307 = arith.constant 307 : index
    %4 = vector.load %arg7[%c0_4, %c307] : memref<4x326xbf16, #tpu.memory_space<vmem>>, vector<4x19xbf16>
    tpu.vector_store %arg7[%c0_4, %c307], %2 {strides = array<i32>} : memref<4x326xbf16, #tpu.memory_space<vmem>>, vector<4x19xbf16>,
    %5 = arith.truncf %1 : vector<4x288xf32> to vector<4x288xbf16>
    %c0_5 = arith.constant 0 : index
    %c19 = arith.constant 19 : index
    %6 = vector.load %arg7[%c0_5, %c19] : memref<4x326xbf16, #tpu.memory_space<vmem>>, vector<4x288xbf16>
    tpu.vector_store %arg7[%c0_5, %c19], %5 {strides = array<i32>} : memref<4x326xbf16, #tpu.memory_space<vmem>>, vector<4x288xbf16>,
    %c0_6 = arith.constant 0 : index
    %c0_7 = arith.constant 0 : index
    %7 = vector.load %arg5[%c0_6, %c0_7] : memref<2x288xf32, #tpu.memory_space<vmem>>, vector<1x288xf32>
    %c1 = arith.constant 1 : index
    %c0_8 = arith.constant 0 : index
    %8 = vector.load %arg5[%c1, %c0_8] : memref<2x288xf32, #tpu.memory_space<vmem>>, vector<1x288xf32>
    %c0_9 = arith.constant 0 : index
    %c0_10 = arith.constant 0 : index
    %9 = vector.load %arg7[%c0_9, %c0_10] : memref<4x326xbf16, #tpu.memory_space<vmem>>, vector<4x326xbf16>
    %10 = vector.extract_strided_slice %9 {offsets = [0, 0], sizes = [4, 288], strides = [1, 1]} : vector<4x326xbf16> to vector<4x288xbf16>
    %c0_11 = arith.constant 0 : index
    %c0_12 = arith.constant 0 : index
    %11 = vector.load %arg9[%c0_11, %c0_12] : memref<36x288xbf16, #tpu.memory_space<vmem>>, vector<4x288xbf16>
    tpu.vector_store %arg9[%c0_11, %c0_12], %10 {strides = array<i32>} : memref<36x288xbf16, #tpu.memory_space<vmem>>, vector<4x288xbf16>,
    %12 = vector.extract_strided_slice %9 {offsets = [0, 1], sizes = [4, 288], strides = [1, 1]} : vector<4x326xbf16> to vector<4x288xbf16>
    %c4 = arith.constant 4 : index
    %c0_13 = arith.constant 0 : index
    %13 = vector.load %arg9[%c4, %c0_13] : memref<36x288xbf16, #tpu.memory_space<vmem>>, vector<4x288xbf16>
    tpu.vector_store %arg9[%c4, %c0_13], %12 {strides = array<i32>} : memref<36x288xbf16, #tpu.memory_space<vmem>>, vector<4x288xbf16>,
    %14 = vector.extract_strided_slice %9 {offsets = [0, 2], sizes = [4, 288], strides = [1, 1]} : vector<4x326xbf16> to vector<4x288xbf16>
    %c8 = arith.constant 8 : index
    %c0_14 = arith.constant 0 : index
    %15 = vector.load %arg9[%c8, %c0_14] : memref<36x288xbf16, #tpu.memory_space<vmem>>, vector<4x288xbf16>
    tpu.vector_store %arg9[%c8, %c0_14], %14 {strides = array<i32>} : memref<36x288xbf16, #tpu.memory_space<vmem>>, vector<4x288xbf16>,
    %16 = vector.extract_strided_slice %9 {offsets = [0, 18], sizes = [4, 288], strides = [1, 1]} : vector<4x326xbf16> to vector<4x288xbf16>
    %c12 = arith.constant 12 : index
    %c0_15 = arith.constant 0 : index
    %17 = vector.load %arg9[%c12, %c0_15] : memref<36x288xbf16, #tpu.memory_space<vmem>>, vector<4x288xbf16>
    tpu.vector_store %arg9[%c12, %c0_15], %16 {strides = array<i32>} : memref<36x288xbf16, #tpu.memory_space<vmem>>, vector<4x288xbf16>,
    %18 = vector.extract_strided_slice %9 {offsets = [0, 19], sizes = [4, 288], strides = [1, 1]} : vector<4x326xbf16> to vector<4x288xbf16>
    %c16 = arith.constant 16 : index
    %c0_16 = arith.constant 0 : index
    %19 = vector.load %arg9[%c16, %c0_16] : memref<36x288xbf16, #tpu.memory_space<vmem>>, vector<4x288xbf16>
    tpu.vector_store %arg9[%c16, %c0_16], %18 {strides = array<i32>} : memref<36x288xbf16, #tpu.memory_space<vmem>>, vector<4x288xbf16>,
    %20 = vector.extract_strided_slice %9 {offsets = [0, 20], sizes = [4, 288], strides = [1, 1]} : vector<4x326xbf16> to vector<4x288xbf16>
    %c20 = arith.constant 20 : index
    %c0_17 = arith.constant 0 : index
    %21 = vector.load %arg9[%c20, %c0_17] : memref<36x288xbf16, #tpu.memory_space<vmem>>, vector<4x288xbf16>
    tpu.vector_store %arg9[%c20, %c0_17], %20 {strides = array<i32>} : memref<36x288xbf16, #tpu.memory_space<vmem>>, vector<4x288xbf16>,
    %22 = vector.extract_strided_slice %9 {offsets = [0, 36], sizes = [4, 288], strides = [1, 1]} : vector<4x326xbf16> to vector<4x288xbf16>
    %c24 = arith.constant 24 : index
    %c0_18 = arith.constant 0 : index
    %23 = vector.load %arg9[%c24, %c0_18] : memref<36x288xbf16, #tpu.memory_space<vmem>>, vector<4x288xbf16>
    tpu.vector_store %arg9[%c24, %c0_18], %22 {strides = array<i32>} : memref<36x288xbf16, #tpu.memory_space<vmem>>, vector<4x288xbf16>,
    %24 = vector.extract_strided_slice %9 {offsets = [0, 37], sizes = [4, 288], strides = [1, 1]} : vector<4x326xbf16> to vector<4x288xbf16>
    %c28 = arith.constant 28 : index
    %c0_19 = arith.constant 0 : index
    %25 = vector.load %arg9[%c28, %c0_19] : memref<36x288xbf16, #tpu.memory_space<vmem>>, vector<4x288xbf16>
    tpu.vector_store %arg9[%c28, %c0_19], %24 {strides = array<i32>} : memref<36x288xbf16, #tpu.memory_space<vmem>>, vector<4x288xbf16>,
    %26 = vector.extract_strided_slice %9 {offsets = [0, 38], sizes = [4, 288], strides = [1, 1]} : vector<4x326xbf16> to vector<4x288xbf16>
    %c32 = arith.constant 32 : index
    %c0_20 = arith.constant 0 : index
    %27 = vector.load %arg9[%c32, %c0_20] : memref<36x288xbf16, #tpu.memory_space<vmem>>, vector<4x288xbf16>
    tpu.vector_store %arg9[%c32, %c0_20], %26 {strides = array<i32>} : memref<36x288xbf16, #tpu.memory_space<vmem>>, vector<4x288xbf16>,
    %c0_21 = arith.constant 0 : index
    %c0_22 = arith.constant 0 : index
    %28 = vector.load %arg2[%c0_21, %c0_22] : memref<4x36xbf16, #tpu.memory_space<vmem>>, vector<4x36xbf16>
    %c0_23 = arith.constant 0 : index
    %c0_24 = arith.constant 0 : index
    %29 = vector.load %arg9[%c0_23, %c0_24] : memref<36x288xbf16, #tpu.memory_space<vmem>>, vector<36x288xbf16>
    %cst_25 = arith.constant dense<0.000000e+00> : vector<4x288xf32>
    %30 = tpu.matmul %28, %29, %cst_25 {dimension_numbers = #tpu.dot_dimension_numbers<[1], [0], [0], [1], [0, 0, 1, 1], [], []>} : vector<4x36xbf16>, vector<36x288xbf16>, vector<4x288xf32> -> vector<4x288xf32>
    %c0_26 = arith.constant 0 : index
    %c0_27 = arith.constant 0 : index
    %31 = vector.load %arg4[%c0_26, %c0_27] : memref<4x2xf32, #tpu.memory_space<vmem>>, vector<4x1xf32>
    %32 = vector.broadcast %31 : vector<4x1xf32> to vector<4x288xf32>
    %33 = arith.addf %30, %32 : vector<4x288xf32>
    %cst_28 = arith.constant 0.000000e+00 : f32
    %34 = vector.broadcast %cst_28 : f32 to vector<4x288xf32>
    %35 = arith.maximumf %33, %34 : vector<4x288xf32>
    %36 = vector.broadcast %7 : vector<1x288xf32> to vector<4x288xf32>
    %37 = arith.mulf %35, %36 : vector<4x288xf32>
    %c0_29 = arith.constant 0 : index
    %c0_30 = arith.constant 0 : index
    %38 = vector.load %arg8[%c0_29, %c0_30] : memref<4x326xbf16, #tpu.memory_space<vmem>>, vector<4x19xbf16>
    tpu.vector_store %arg8[%c0_29, %c0_30], %2 {strides = array<i32>} : memref<4x326xbf16, #tpu.memory_space<vmem>>, vector<4x19xbf16>,
    %c0_31 = arith.constant 0 : index
    %c307_32 = arith.constant 307 : index
    %39 = vector.load %arg8[%c0_31, %c307_32] : memref<4x326xbf16, #tpu.memory_space<vmem>>, vector<4x19xbf16>
    tpu.vector_store %arg8[%c0_31, %c307_32], %2 {strides = array<i32>} : memref<4x326xbf16, #tpu.memory_space<vmem>>, vector<4x19xbf16>,
    %40 = arith.truncf %37 : vector<4x288xf32> to vector<4x288xbf16>
    %c0_33 = arith.constant 0 : index
    %c19_34 = arith.constant 19 : index
    %41 = vector.load %arg8[%c0_33, %c19_34] : memref<4x326xbf16, #tpu.memory_space<vmem>>, vector<4x288xbf16>
    tpu.vector_store %arg8[%c0_33, %c19_34], %40 {strides = array<i32>} : memref<4x326xbf16, #tpu.memory_space<vmem>>, vector<4x288xbf16>,
    %c0_35 = arith.constant 0 : index
    %c0_36 = arith.constant 0 : index
    %42 = vector.load %arg8[%c0_35, %c0_36] : memref<4x326xbf16, #tpu.memory_space<vmem>>, vector<4x326xbf16>
    %43 = vector.extract_strided_slice %42 {offsets = [0, 0], sizes = [4, 288], strides = [1, 1]} : vector<4x326xbf16> to vector<4x288xbf16>
    %c0_37 = arith.constant 0 : index
    %c0_38 = arith.constant 0 : index
    %44 = vector.load %arg9[%c0_37, %c0_38] : memref<36x288xbf16, #tpu.memory_space<vmem>>, vector<4x288xbf16>
    tpu.vector_store %arg9[%c0_37, %c0_38], %43 {strides = array<i32>} : memref<36x288xbf16, #tpu.memory_space<vmem>>, vector<4x288xbf16>,
    %45 = vector.extract_strided_slice %42 {offsets = [0, 1], sizes = [4, 288], strides = [1, 1]} : vector<4x326xbf16> to vector<4x288xbf16>
    %c4_39 = arith.constant 4 : index
    %c0_40 = arith.constant 0 : index
    %46 = vector.load %arg9[%c4_39, %c0_40] : memref<36x288xbf16, #tpu.memory_space<vmem>>, vector<4x288xbf16>
    tpu.vector_store %arg9[%c4_39, %c0_40], %45 {strides = array<i32>} : memref<36x288xbf16, #tpu.memory_space<vmem>>, vector<4x288xbf16>,
    %47 = vector.extract_strided_slice %42 {offsets = [0, 2], sizes = [4, 288], strides = [1, 1]} : vector<4x326xbf16> to vector<4x288xbf16>
    %c8_41 = arith.constant 8 : index
    %c0_42 = arith.constant 0 : index
    %48 = vector.load %arg9[%c8_41, %c0_42] : memref<36x288xbf16, #tpu.memory_space<vmem>>, vector<4x288xbf16>
    tpu.vector_store %arg9[%c8_41, %c0_42], %47 {strides = array<i32>} : memref<36x288xbf16, #tpu.memory_space<vmem>>, vector<4x288xbf16>,
    %49 = vector.extract_strided_slice %42 {offsets = [0, 18], sizes = [4, 288], strides = [1, 1]} : vector<4x326xbf16> to vector<4x288xbf16>
    %c12_43 = arith.constant 12 : index
    %c0_44 = arith.constant 0 : index
    %50 = vector.load %arg9[%c12_43, %c0_44] : memref<36x288xbf16, #tpu.memory_space<vmem>>, vector<4x288xbf16>
    tpu.vector_store %arg9[%c12_43, %c0_44], %49 {strides = array<i32>} : memref<36x288xbf16, #tpu.memory_space<vmem>>, vector<4x288xbf16>,
    %51 = vector.extract_strided_slice %42 {offsets = [0, 19], sizes = [4, 288], strides = [1, 1]} : vector<4x326xbf16> to vector<4x288xbf16>
    %c16_45 = arith.constant 16 : index
    %c0_46 = arith.constant 0 : index
    %52 = vector.load %arg9[%c16_45, %c0_46] : memref<36x288xbf16, #tpu.memory_space<vmem>>, vector<4x288xbf16>
    tpu.vector_store %arg9[%c16_45, %c0_46], %51 {strides = array<i32>} : memref<36x288xbf16, #tpu.memory_space<vmem>>, vector<4x288xbf16>,
    %53 = vector.extract_strided_slice %42 {offsets = [0, 20], sizes = [4, 288], strides = [1, 1]} : vector<4x326xbf16> to vector<4x288xbf16>
    %c20_47 = arith.constant 20 : index
    %c0_48 = arith.constant 0 : index
    %54 = vector.load %arg9[%c20_47, %c0_48] : memref<36x288xbf16, #tpu.memory_space<vmem>>, vector<4x288xbf16>
    tpu.vector_store %arg9[%c20_47, %c0_48], %53 {strides = array<i32>} : memref<36x288xbf16, #tpu.memory_space<vmem>>, vector<4x288xbf16>,
    %55 = vector.extract_strided_slice %42 {offsets = [0, 36], sizes = [4, 288], strides = [1, 1]} : vector<4x326xbf16> to vector<4x288xbf16>
    %c24_49 = arith.constant 24 : index
    %c0_50 = arith.constant 0 : index
    %56 = vector.load %arg9[%c24_49, %c0_50] : memref<36x288xbf16, #tpu.memory_space<vmem>>, vector<4x288xbf16>
    tpu.vector_store %arg9[%c24_49, %c0_50], %55 {strides = array<i32>} : memref<36x288xbf16, #tpu.memory_space<vmem>>, vector<4x288xbf16>,
    %57 = vector.extract_strided_slice %42 {offsets = [0, 37], sizes = [4, 288], strides = [1, 1]} : vector<4x326xbf16> to vector<4x288xbf16>
    %c28_51 = arith.constant 28 : index
    %c0_52 = arith.constant 0 : index
    %58 = vector.load %arg9[%c28_51, %c0_52] : memref<36x288xbf16, #tpu.memory_space<vmem>>, vector<4x288xbf16>
    tpu.vector_store %arg9[%c28_51, %c0_52], %57 {strides = array<i32>} : memref<36x288xbf16, #tpu.memory_space<vmem>>, vector<4x288xbf16>,
    %59 = vector.extract_strided_slice %42 {offsets = [0, 38], sizes = [4, 288], strides = [1, 1]} : vector<4x326xbf16> to vector<4x288xbf16>
    %c32_53 = arith.constant 32 : index
    %c0_54 = arith.constant 0 : index
    %60 = vector.load %arg9[%c32_53, %c0_54] : memref<36x288xbf16, #tpu.memory_space<vmem>>, vector<4x288xbf16>
    tpu.vector_store %arg9[%c32_53, %c0_54], %59 {strides = array<i32>} : memref<36x288xbf16, #tpu.memory_space<vmem>>, vector<4x288xbf16>,
    %c0_55 = arith.constant 0 : index
    %c0_56 = arith.constant 0 : index
    %61 = vector.load %arg3[%c0_55, %c0_56] : memref<4x36xbf16, #tpu.memory_space<vmem>>, vector<4x36xbf16>
    %c0_57 = arith.constant 0 : index
    %c0_58 = arith.constant 0 : index
    %62 = vector.load %arg9[%c0_57, %c0_58] : memref<36x288xbf16, #tpu.memory_space<vmem>>, vector<36x288xbf16>
    %cst_59 = arith.constant dense<0.000000e+00> : vector<4x288xf32>
    %63 = tpu.matmul %61, %62, %cst_59 {dimension_numbers = #tpu.dot_dimension_numbers<[1], [0], [0], [1], [0, 0, 1, 1], [], []>} : vector<4x36xbf16>, vector<36x288xbf16>, vector<4x288xf32> -> vector<4x288xf32>
    %c0_60 = arith.constant 0 : index
    %c1_61 = arith.constant 1 : index
    %64 = vector.load %arg4[%c0_60, %c1_61] : memref<4x2xf32, #tpu.memory_space<vmem>>, vector<4x1xf32>
    %65 = vector.broadcast %64 : vector<4x1xf32> to vector<4x288xf32>
    %66 = arith.addf %63, %65 : vector<4x288xf32>
    %67 = vector.broadcast %8 : vector<1x288xf32> to vector<4x288xf32>
    %68 = arith.mulf %66, %67 : vector<4x288xf32>
    %69 = arith.addf %68, %1 : vector<4x288xf32>
    %c0_62 = arith.constant 0 : index
    %c0_63 = arith.constant 0 : index
    %c0_64 = arith.constant 0 : index
    %70 = vector.load %arg6[%c0_62, %c0_63, %c0_64] : memref<1x4x288xf32, #tpu.memory_space<vmem>>, vector<1x4x288xf32>
    %71 = vector.shape_cast %70 : vector<1x4x288xf32> to vector<4x288xf32>
    %72 = vector.shape_cast %69 : vector<4x288xf32> to vector<1x4x288xf32>
    tpu.vector_store %arg6[%c0_62, %c0_63, %c0_64], %72 {strides = array<i32>} : memref<1x4x288xf32, #tpu.memory_space<vmem>>, vector<1x4x288xf32>,
    return
  }
  func.func @transform_0(%arg0: i32) -> (i32, i32, i32) {
    %c0_i32 = arith.constant 0 : i32
    %c0_i32_0 = arith.constant 0 : i32
    %c0_i32_1 = arith.constant 0 : i32
    return %arg0, %c0_i32, %c0_i32_0 : i32, i32, i32
  }
  func.func @transform_1(%arg0: i32) -> (i32, i32) {
    %c0_i32 = arith.constant 0 : i32
    %c0_i32_0 = arith.constant 0 : i32
    %c0_i32_1 = arith.constant 0 : i32
    return %c0_i32, %c0_i32_0 : i32, i32
  }
  func.func @transform_2(%arg0: i32) -> (i32, i32) {
    %c0_i32 = arith.constant 0 : i32
    %c0_i32_0 = arith.constant 0 : i32
    %c0_i32_1 = arith.constant 0 : i32
    return %c0_i32, %c0_i32_0 : i32, i32
  }
  func.func @transform_3(%arg0: i32) -> (i32, i32) {
    %c0_i32 = arith.constant 0 : i32
    %c0_i32_0 = arith.constant 0 : i32
    %c0_i32_1 = arith.constant 0 : i32
    return %c0_i32, %c0_i32_0 : i32, i32
  }
  func.func @transform_4(%arg0: i32) -> (i32, i32) {
    %c0_i32 = arith.constant 0 : i32
    %c0_i32_0 = arith.constant 0 : i32
    %c0_i32_1 = arith.constant 0 : i32
    return %c0_i32, %c0_i32_0 : i32, i32
  }
  func.func @transform_5(%arg0: i32) -> (i32, i32, i32) {
    %c0_i32 = arith.constant 0 : i32
    %c0_i32_0 = arith.constant 0 : i32
    %c0_i32_1 = arith.constant 0 : i32
    return %arg0, %c0_i32, %c0_i32_0 : i32, i32, i32
  }
}

</mosaic_0001>

<bundles_post_ra>
// kernel: tpu_custom_call.1
= control target key start
LH: loop header
LB: loop body
LE: loop exit
PB: predicated region body
PF: predicated region fallthrough
CT: control target
= control target key end

     0   :  { %10 = vsyncpa [#allocation6], 0  ;;  %s1632_s0 = inlined_call_operand.hbm [shape: f32[2,4,288], index: 0, kind: input, shape index: {}]   ;;  %s1633_s1 = inlined_call_operand.vmem [shape: bf16[4,36], index: 1, kind: input, shape index: {}]   ;;  %s1634_s2 = inlined_call_operand.vmem [shape: bf16[4,36], index: 2, kind: input, shape index: {}]   ;;  %s1635_s3 = inlined_call_operand.vmem [shape: f32[4,2], index: 3, kind: input, shape index: {}]   ;;  %s1636_s4 = inlined_call_operand.vmem [shape: f32[2,288], index: 4, kind: input, shape index: {}]   ;;  %s1637_s5 = inlined_call_operand.hbm [shape: f32[2,4,288], index: 5, kind: output, shape index: {}]  }
   0x1   :  { %12 = vsyncpa [#allocation6 + $0x1], 0 }
   0x2   :  { %13 = vsyncpa [#allocation7], 0 }
   0x3   :  { %15 = vsyncpa [#allocation7 + $0x1], 0  ;;  %s1311_s18 = smov 0   ;;  %s1313_s19 = smov 0  }
   0x4   :  { %s1315_s20 = smov 0   ;;  %s1317_s21 = smov 0  }
   0x5 LB: > { %s1332_s22 = sadd.s32 4294967295, %s1263_s21   ;;  %s1017_s23 = sadd.s32 4294967294, %s1263_s21   ;;  %s1263_s21 = sphi %s1317_s21, %s1655_s21   ;;  %s1259_s20 = sphi %s1315_s20, %s1654_s20   ;;  %s1255_s19 = sphi %s1313_s19, %s1653_s19   ;;  %s1251_s18 = sphi %s1311_s18, %s1652_s18  }
   0x6   : > { %s1336_s24 = sadd.s32 1, %s1263_s21   ;;  %s28_s25 = sadd.s32 1, %s1259_s20 }
   0x7   : > { %s25_s26 = ssub.s32 %s1263_s21, %s1336_s24  ;;  %p35_p0 = scmp.ne.s32.totalorder %s1259_s20, %s1255_s19 }
   0x8   : > { %p26_p1 = scmp.eq.s32.totalorder %s25_s26, 0  ;;  %p36_p2 = scmp.eq.s32.totalorder %s1263_s21, 0 }
   0x9   : > { %p41_p3 = scmp.ne.s32.totalorder %s1255_s19, %s1251_s18  ;;  %p42_p4 = scmp.eq.s32.totalorder %s1332_s22, 0 }
   0xa   : > { %s1348_s27 = scalar_select %p26_p1, %s1259_s20, %s28_s25  }
   0xb   : > { %p37_p5 = por %p36_p2, %p35_p0  ;;  %p1350_p6 = por %p42_p4, %p41_p3 }
   0xc   : > { %p149_p7 = scmp.eq.s32.totalorder %s1332_s22, 1  ;;  %p155_p8 = scmp.eq.s32.totalorder %s1017_s23, 1 }
   0xd   : > { %s1640_s28 = scalar_select %p1350_p6, 1, 0 }
   0xe   : > { %p1098_p10 = scmp.lt.s32.totalorder %s1263_s21, 2  ;;  %p1357_p11 = por %p149_p7, %p35_p0 }
   0xf   : > { %p1361_p12 = por %p155_p8, %p41_p3  ;;  %s187_s6 = sand.u32 1, %s1259_s20  }
  0x10   : > { %s1641_s29 = scalar_select %p1357_p11, 1, 0 }
  0x11   : > { %s1642_s30 = scalar_select %p1361_p12, 1, 0 }
  0x12   : > { %s1083_s7 = smul.u32 192, %s1263_s21  ;;  %p1372_p13 = pnand %p1098_p10, %p37_p5 }
  0x13   : > { %s1082_s8 = smul.u32 12, %s187_s6  ;;  %s188_s15 = scalar_lea.sflag [#allocation6], %s187_s6 }
  0x14   : > { %s1370_s11 = scalar_lea.hbm %s1632_s0, %s1083_s7  ;;  %p1173_p3 = pneg %p1372_p13 }
  0x15   : > { %s191_s13 = scalar_lea.vmem [#allocation5], %s1082_s8  ;;  %s1171_s16 = scalar_lea.hbm %s1370_s11, 192 }
  0x16   : > { %s199_s14 = sshll.u32 %s191_s13, 4  ;;  %p1172_p2 = scmp.ne.s32.totalorder %s1370_s11, %s1171_s16  ;;  %s200_s14 = int_to_ptr.vmem [resolvable:$true] %s199_s14 }
  0x17   : > { %s1176_s25 = scalar_lea.hbm %s1632_s0, 384  ;;  %p1177_p5 = scmp.lt.s32.totalorder %s1370_s11, %s1632_s0 }
  0x18   : > { %p1174_p4 = pnand %p1173_p3, %p1172_p2  ;;  %p1178_p8 = scmp.lt.s32.totalorder %s1176_s25, %s1171_s16 }
  0x1a   : > { %p1175_p7 = pneg %p1174_p4  ;;  %p1179_p10 = por %p1178_p8, %p1177_p5 }
  0x1c   : > { %p1180_p9 = pnand %p1179_p10, %p1175_p7 }
  0x1e   : > { %1183 = shalt.err (!%p1180_p9)
}
  0x1f   : > { %s1184_s8 = scalar_lea.vmem %s200_s14, 192  ;;  %s1265_s6 = smov [#allocation5]  }
  0x20   : > { %p1185_p0 = scmp.ne.s32.totalorder %s200_s14, %s1184_s8  ;;  %s1189_s9 = sshll.u32 %s1265_s6, 4  ;;  %s1190_s9 = int_to_ptr.vmem [resolvable:$false] %s1189_s9 }
  0x21   : > { %s1191_s10 = scalar_lea.vmem %s1190_s9, 384  ;;  %p1192_p2 = scmp.lt.s32.totalorder %s200_s14, %s1190_s9 }
  0x22   : > { %p1187_p1 = pnand %p1185_p0, %p1173_p3  ;;  %p1193_p4 = scmp.lt.s32.totalorder %s1191_s10, %s1184_s8 }
  0x24   : > { %p1188_p12 = pneg %p1187_p1  ;;  %p1194_p11 = por %p1193_p4, %p1192_p2 }
  0x26   : > { %p1195_p6 = pnand %p1194_p11, %p1188_p12 }
  0x28   : > { %1198 = shalt.err (!%p1195_p6)
}
  0x29   : > { %1093 = dma.hbm_to_vmem [thread:$0]  (!%p1372_p13), %s1370_s11, 192, %s200_s14, %s188_s15  }
  0x2a   : > { %p1644_p9 = scmp.lt.s32.totalorder %s1263_s21, 3  ;;  %p1645_p7 = scmp.ge.s32.totalorder %s1263_s21, 1 }
  0x2c   : > { %p205_p5 = pnand %p1645_p7, %p1644_p9 }
  0x2d   : > { %s1397_s13 = sand.u32 (!%p205_p5), 1, %s1255_s19   ;;  %p1646_p6 = scmp.ne.s32.totalorder (!%p205_p5), %s1640_s28, 0 }
  0x2e   : > { %208 = sbr.rel (%p205_p5) target bundleno = 1062 (0x426), region = 40  ;;  %s211_s17 = scalar_lea.sflag (!%p205_p5), [#allocation6], %s1397_s13 }
  0x2f   : > { %s1084_s16 = smul.u32 (!%p205_p5), 12, %s1397_s13 }
  0x31   : > { %s214_s23 = scalar_lea.vmem (!%p205_p5), [#allocation5], %s1084_s16 }
  0x33   : > { %1242 = dma.done.wait (%p1646_p6), %s211_s17, 192  }
  0x34   : > { %1244 = vsyncadd (%p1646_p6), %s211_s17, 4294967104  ;;  %v261_v0 = vlaneseq  ;;  %vm244_vm0 = vcmask 148480   ;;  %v1266_v1 = vmov 1983009808   ;;  %v1267_v3 = vmov 0   ;;  %v1418_v7 = vld [vmem:[%s214_s23] sm:$0xff] }
  0x35   : > { %v259_v2 = vunpack.c.l.s4 %v1266_v1  ;;  %245 = vst.msk [vmem:[#allocation2] sm:$0x3] %vm244_vm0, %v1267_v3  ;;  %vm246_vm1 = vcmask 566680   ;;  %598 = vst.msk [vmem:[#allocation3] sm:$0x3] %vm244_vm0, %v1267_v3  ;;  %527 = vmatprep.mubr.bf16.mxu0 %v1267_v3  ;;  %1146 = vset.pattern.permute.xlu1 %v1267_v3  ;;  %v1424_v9 = vcombine.high %v1418_v7, %v1418_v7  ;;  %s1268_s28 = smov 19  }
  0x36   : > { %v1411_v4 = vshrl.u32 %v261_v0, 7  ;;  %247 = vst.msk [vmem:[#allocation2 + $0x4] sm:$0x3] %vm246_vm1, %v1267_v3  ;;  %599 = vst.msk [vmem:[#allocation3 + $0x4] sm:$0x3] %vm246_vm1, %v1267_v3  ;;  %vm279_vm2 = vcmask 1041560  }
  0x37   : > { %v260_v5 = vunpack.c.0.s8 %v259_v2  ;;  %v1420_v8 = vld [vmem:[%s214_s23 + $0x8] sm:$0xf]  ;;  %v1022_v11 = vpack.c.bf16 %v1424_v9, %v1418_v7  ;;  %vm280_vm3 = vcmask 1043458   ;;  %vm282_vm5 = vcmask 414724   ;;  %s1269_s11 = smov 109   ;;  %s1270_s12 = smov 90  }
  0x38   : > { %v253_v10 = vpack.c.bf16 %v1420_v8, %v1420_v8  ;;  %vm281_vm4 = vmor %vm280_vm3, %vm279_vm2  ;;  %vm276_vm6 = vcmask 154624   ;;  %vm308_vm8 = vcmask 254976   ;;  %s1271_s14 = smov 92   ;;  %s1272_s15 = smov 108   ;;  %v1275_v23 = vmov 0.0  }
  0x39   : > { %v1416_v6 = vsub.s32 %v260_v5, %v1411_v4  ;;  %vm1433_vm7 = vmor %vm282_vm5, %vm281_vm4  ;;  %s1273_s25 = smov 126   ;;  %s1274_s26 = smov 91   ;;  %1062 = vmatprep.subr.bf16.mxu1 %v1275_v23  ;;  %vm1277_vm9 = vmmov 0   ;;  %v435_v26 = vld [vmem:[%s1635_s3] sm:$0xf]  ;;  %vm331_vm10 = vcmask 257026  }
  0x3a   : > { %s1276_s7 = smov 127   ;;  %1068 = vmatprep.mubr.msk.bf16.mxu1 %vm1277_vm9, %v1275_v23  ;;  %s1278_s8 = smov 110   ;;  %vm324_vm11 = vcmask 1043456   ;;  %vm418_vm12 = vcmask 736256   ;;  %vm366_vm13 = vcmask 891904   ;;  %vm379_vm14 = vcmask 883712  }
  0x3b   : > { %v271_v12 = vrot.slane %v253_v10, %v1416_v6  ;;  %v264_v13 = vrot.slane %v1022_v11, %v1416_v6  ;;  %vm392_vm15 = vcmask 752640   ;;  %vm485_vm0 = vcmask 1041408   ;;  %p1649_p12 = scmp.ne.s32.totalorder %s1641_s29, 0 }
  0x3c   : > { %vm405_vm1 = vcmask 744448   ;;  %vm340_vm2 = vcmask 1031168   ;;  %vm326_vm3 = vcmask 1039360   ;;  %vm353_vm4 = vcmask 900096  }
  0x3d   : > { %v272_v14 = vcombine.low %v264_v13, %v271_v12  ;;  %vm481_vm5 = vcmask 293888  }
  0x3f   : > { %273 = vrot.lane.b32.xlu0 %v272_v14, %s1268_s28 }
  0xb1   : > { %v274_v15 = vpop.permute.xlu0 %273 }
  0xb2   : > { %v275_v17 = vrot.slane %v274_v15, 6 }
  0xb4   : > { %v277_v18 = vsel %vm276_vm6, %v275_v17, %v274_v15 }
  0xb5   : > { %284 = vst.msk [vmem:[#allocation2] sm:$0x3f] %vm1433_vm7, %v277_v18 }
  0xbc   : > { %v288_v19 = vld [vmem:[#allocation2] sm:$0x3f] }
  0xbd   : > { %v297_v20 = vrot.slane %v288_v19, %v1416_v6  ;;  %1024 = vst.sshfl [vmem:[#allocation4] sm:$0xf pattern:$0x76325410] %v288_v19  ;;  %v290_v21 = vcombine.high %v288_v19, %v288_v19  ;;  %v310_v24 = vcombine.low %v288_v19, %v288_v19 }
  0xbf   : > { %359 = vrot.lane.b32.xlu1 %v297_v20, %s1269_s11  ;;  %411 = vrot.lane.b32.xlu0 %v297_v20, %s1270_s12  ;;  %v304_v22 = vrot.slane %v290_v21, %v1416_v6  ;;  %v317_v25 = vrot.slane %v310_v24, %v1416_v6 }
  0xc1   : > { %309 = vst.msk [vmem:[#allocation4 + $0x8] sm:$0x3] %vm308_vm8, %v304_v22 }
  0xc3   : > { %385 = vrot.lane.b32.xlu1 %v297_v20, %s1271_s14  ;;  %374 = vrot.lane.b32.xlu0 %v297_v20, %s1272_s15 }
  0xc7   : > { %333 = vrot.lane.b32.xlu1 %v297_v20, %s1273_s25  ;;  %400 = vrot.lane.b32.xlu0 %v297_v20, %s1274_s26 }
  0xcb   : > { %320 = vrot.lane.b32.xlu0 %v297_v20, %s1276_s7  ;;  %413 = vrot.lane.b32.xlu1 %v304_v22, %s1270_s12 }
  0xcf   : > { %361 = vrot.lane.b32.xlu0 %v304_v22, %s1269_s11  ;;  %372 = vrot.lane.b32.xlu1 %v317_v25, %s1272_s15 }
  0xd3   : > { %387 = vrot.lane.b32.xlu0 %v304_v22, %s1271_s14  ;;  %398 = vrot.lane.b32.xlu1 %v317_v25, %s1274_s26 }
  0xd7   : > { %335 = vrot.lane.b32.xlu0 %v304_v22, %s1273_s25  ;;  %318 = vrot.lane.b32.xlu1 %v317_v25, %s1276_s7 }
  0xdb   : > { %348 = vrot.lane.b32.xlu0 %v297_v20, %s1278_s8  ;;  %346 = vrot.lane.b32.xlu1 %v317_v25, %s1278_s8 }
  0xdf   : > { %438 = vperm.xlu1 %1146, %v435_v26  }
 0x131   : > { %v360_v27 = vpop.permute.xlu1 %359  ;;  %v412_v28 = vpop.permute.xlu0 %411 }
 0x132   : > { %v415_v35 = vrot.slane %v412_v28, 4  ;;  %v363_v41 = vrot.slane %v360_v27, 4 }
 0x135   : > { %v386_v29 = vpop.permute.xlu1 %385  ;;  %v375_v30 = vpop.permute.xlu0 %374 }
 0x136   : > { %384 = vst.msk [vmem:[#allocation4 + $0x20] sm:$0xc] %vm331_vm10, %v375_v30  ;;  %v377_v42 = vrot.slane %v375_v30, 4  ;;  %v389_v52 = vrot.slane %v386_v29, 4 }
 0x139   : > { %v1467_v31 = vpop.permute.xlu1 %333  ;;  %v401_v32 = vpop.permute.xlu0 %400 }
 0x13a   : > { %410 = vst.msk [vmem:[#allocation4 + $0x2c] sm:$0xc] %vm331_vm10, %v401_v32  ;;  %v403_v53 = vrot.slane %v401_v32, 4  ;;  %v337_v59 = vrot.slane %v1467_v31, 4  ;;  %v590_v32 = vsub.s32 2, %v1411_v4 }
 0x13d   : > { %v321_v33 = vpop.permute.xlu0 %320  ;;  %v414_v34 = vpop.permute.xlu1 %413 }
 0x13e   : > { %332 = vst.msk [vmem:[#allocation4 + $0x8] sm:$0xc] %vm331_vm10, %v321_v33  ;;  %v416_v36 = vrot.slane %v414_v34, 4  ;;  %v323_v60 = vrot.slane %v321_v33, 4 }
 0x13f   : > { %423 = vst.msk [vmem:[#allocation4 + $0x38] sm:$0x3] %vm308_vm8, %v414_v34 }
 0x140   : > { %v417_v37 = vsel %vm324_vm11, %v415_v35, %v416_v36  ;;  %v285_v35 = vld [vmem:[%s1636_s4] ss:$2 sm:$0x7] }
 0x141   : > { %v419_v38 = vsel %vm418_vm12, %v412_v28, %v417_v37  ;;  %v362_v39 = vpop.permute.xlu0 %361  ;;  %v373_v40 = vpop.permute.xlu1 %372 }
 0x142   : > { %422 = vst [vmem:[#allocation4 + $0x30] sm:$0x33] %v419_v38  ;;  %v364_v43 = vrot.slane %v362_v39, 4  ;;  %371 = vst.msk [vmem:[#allocation4 + $0x20] sm:$0x3] %vm308_vm8, %v362_v39  ;;  %v376_v44 = vrot.slane %v373_v40, 4  ;;  %v591_v38 = vrot.slane %v285_v35, %v590_v32 }
 0x144   : > { %v365_v45 = vsel %vm324_vm11, %v363_v41, %v364_v43  ;;  %v378_v46 = vsel %vm324_vm11, %v376_v44, %v377_v42  ;;  %v586_v42 = vsub.s32 1, %v1411_v4 }
 0x145   : > { %v367_v47 = vsel %vm366_vm13, %v360_v27, %v365_v45  ;;  %v380_v48 = vsel %vm379_vm14, %v373_v40, %v378_v46  ;;  %v388_v49 = vpop.permute.xlu0 %387  ;;  %v399_v50 = vpop.permute.xlu1 %398  ;;  %v582_v40 = vsub.s32 0, %v1411_v4 }
 0x146   : > { %v1150_v51 = vld [vmem:[#allocation4 + $0x38] ss:$0 sps:$4 sm:$0x33]   ;;  %370 = vst [vmem:[#allocation4 + $0x18] sm:$0x33] %v367_v47  ;;  %v390_v54 = vrot.slane %v388_v49, 4 }
 0x147   : > { %383 = vst [vmem:[#allocation4 + $0x18] sm:$0xcc] %v380_v48  ;;  %397 = vst.msk [vmem:[#allocation4 + $0x2c] sm:$0x3] %vm308_vm8, %v388_v49  ;;  %v402_v55 = vrot.slane %v399_v50, 4  ;;  %v493_v56 = vsel %vm485_vm0, %v1150_v51, 0  ;;  %v583_v47 = vrot.slane %v285_v35, %v582_v40 }
 0x148   : > { %v391_v57 = vsel %vm324_vm11, %v389_v52, %v390_v54  ;;  %1063 = vmatpush3.bf16.msra.mxu1 %v493_v56 }
 0x149   : > { %v404_v58 = vsel %vm324_vm11, %v402_v55, %v403_v53  ;;  %v393_v61 = vsel %vm392_vm15, %v386_v29, %v391_v57  ;;  %v336_v63 = vpop.permute.xlu0 %335  ;;  %v319_v0 = vpop.permute.xlu1 %318  ;;  %v433_v1 = vld [vmem:[#allocation4 + $0x30] sm:$0x33]  ;;  %1064 = vmatprep.subr.bf16.mxu1 %v1275_v23 }
 0x14a   : > { %v406_v62 = vsel %vm405_vm1, %v399_v50, %v404_v58  ;;  %396 = vst [vmem:[#allocation4 + $0x24] sm:$0x33] %v393_v61  ;;  %v338_v2 = vrot.slane %v336_v63, 4  ;;  %345 = vst.msk [vmem:[#allocation4 + $0x14] sm:$0x3] %vm308_vm8, %v336_v63  ;;  %v322_v5 = vrot.slane %v319_v0, 4  ;;  %v1032_v10 = vcombine.high %v433_v1, %v433_v1 }
 0x14b   : > { %409 = vst [vmem:[#allocation4 + $0x24] sm:$0xcc] %v406_v62  ;;  %v1031_v11 = vcombine.low %v433_v1, %v433_v1  ;;  %v424_v29 = vld [vmem:[%s1633_s1] sm:$0x3]  ;;  %v587_v50 = vrot.slane %v285_v35, %v586_v42 }
 0x14c   : > { %v339_v12 = vsel %vm324_vm11, %v337_v59, %v338_v2  ;;  %v325_v13 = vsel %vm324_vm11, %v322_v5, %v323_v60  ;;  %1034 = vmatprep.subr.msk.bf16.mxu0 %vm485_vm0, %v1032_v10 }
 0x14d   : > { %v487_v14 = vsel %vm485_vm0, %v1031_v11, 0  ;;  %v341_v15 = vsel %vm340_vm2, %v1467_v31, %v339_v12  ;;  %v327_v17 = vsel %vm326_vm3, %v319_v0, %v325_v13  ;;  %v349_v18 = vpop.permute.xlu0 %348  ;;  %v347_v19 = vpop.permute.xlu1 %346  ;;  %v1279_v11 = vmov 1  }
 0x14e   : > { %506 = vmatpush1.bf16.msra.mxu0 %v487_v14  ;;  %v1152_v20 = vld [vmem:[#allocation4 + $0x20] ss:$12 sps:$4 sm:$0xff]   ;;  %344 = vst [vmem:[#allocation4 + $0xc] sm:$0x33] %v341_v15  ;;  %330 = vst [vmem:[#allocation4] sm:$0xcc] %v327_v17  ;;  %1147 = vset.pattern.permute.xlu1 %v1279_v11 }
 0x14f   : > { %v351_v21 = vrot.slane %v349_v18, 4  ;;  %358 = vst.msk [vmem:[#allocation4 + $0x14] sm:$0xc] %vm331_vm10, %v349_v18  ;;  %v350_v22 = vrot.slane %v347_v19, 4  ;;  %1065 = vmatpush3.bf16.msra.mxu1 %v1152_v20  ;;  %1148 = vset.pattern.permute.xlu0 %v1279_v11 }
 0x150   : > { %1066 = vmatprep.subr.bf16.mxu1 %v1275_v23 }
 0x151   : > { %v352_v24 = vsel %vm324_vm11, %v350_v22, %v351_v21 }
 0x152   : > { %v354_v25 = vsel %vm353_vm4, %v347_v19, %v352_v24  ;;  %v1153_v26 = vld [vmem:[#allocation4 + $0x1c] ss:$12 sps:$4 sm:$0xff]   ;;  %v1155_v27 = vld [vmem:[#allocation4 + $0x18] ss:$12 sps:$4 sm:$0xff]  }
 0x153   : > { %357 = vst [vmem:[#allocation4 + $0xc] sm:$0xcc] %v354_v25  ;;  %507 = vmatprep.subr.bf16.mxu0 %v1153_v26 }
 0x154   : > { %508 = vmatpush1.bf16.msra.mxu0 %v1155_v27 }
 0x156   : > { %v1156_v28 = vld [vmem:[#allocation4 + $0x8] ss:$12 sps:$4 sm:$0xff]  }
 0x157   : > { %1067 = vmatpush3.bf16.msra.mxu1 %v1156_v28 }
 0x158   : > { %1072 = vmatprep.subr.bf16.mxu1 %v1275_v23 }
 0x15a   : > { %v1157_v30 = vld [vmem:[#allocation4 + $0x4] ss:$12 sps:$4 sm:$0xff]   ;;  %v1159_v31 = vld [vmem:[#allocation4] ss:$12 sps:$4 sm:$0xff]   ;;  %1069 = vmatmul.mubr.msk.bf16.vlgmr.msra.gmra.mxu1 %vm481_vm5, %v424_v29  ;;  %v439_v34 = vpop.permute.xlu1 %438 }
 0x15b   : > { %509 = vmatprep.subr.bf16.mxu0 %v1157_v30  ;;  %1078 = vmatprep.mubr.msk.bf16.mxu1 %vm1277_vm9, %v1275_v23 }
 0x15c   : > { %510 = vmatpush1.bf16.msra.mxu0 %v1159_v31 }
 0x15f   : > { %1035 = vmatmul.mubr.msk.bf16.vlgmr.msra.gmra.mxu0 %vm481_vm5, %v424_v29 }
 0x160   : > { %854 = vmatprep.mubr.bf16.mxu0 %v1267_v3 }
 0x21a   : > { %v570_v33 = vpop.f32.mrf.mxu1 }
 0x21b   : > { %v571_v36 = vadd.f32 %v570_v33, %v439_v34 }
 0x21c   : > { %v1070_v37 = vpop.f32.mrf.mxu1 }
 0x21d   : > { %v578_v39 = vmax.f32 %v571_v36, 0.0 }
 0x21e   : > { %v573_v41 = vpop.f32.mrf.mxu1 }
 0x21f   : > { %v529_v3 = vpop.f32.mrf.mxu0  ;;  %v597_v44 = vmul.f32 %v591_v38, %v578_v39 }
 0x220   : > { %v530_v43 = vadd.f32 %v529_v3, %v439_v34  ;;  %v1071_v45 = vpop.f32.mrf.mxu1 }
 0x221   : > { %v531_v46 = vpop.f32.mrf.mxu0  ;;  %v602_v52 = vpack.c.bf16 %v597_v44, %v597_v44 }
 0x222   : > { %v576_v48 = vmax.f32 %v530_v43, 0.0  ;;  %v532_v49 = vadd.f32 %v531_v46, %v439_v34 }
 0x223   : > { %v533_v51 = vpop.f32.mrf.mxu0  ;;  %v620_v58 = vrot.slane %v602_v52, %v1416_v6 }
 0x224   : > { %v577_v53 = vmax.f32 %v532_v49, 0.0  ;;  %v595_v55 = vmul.f32 %v583_v47, %v576_v48 }
 0x225   : > { %v534_v54 = vpop.f32.mrf.mxu0 }
 0x226   : > { %v596_v56 = vmul.f32 %v587_v50, %v577_v53 }
 0x228   : > { %v1037_v57 = vpack.c.bf16 %v596_v56, %v595_v55 }
 0x22a   : > { %v613_v59 = vrot.slane %v1037_v57, %v1416_v6 }
 0x22c   : > { %v621_v60 = vcombine.low %v613_v59, %v620_v58 }
 0x22e   : > { %622 = vrot.lane.b32.xlu0 %v621_v60, %s1268_s28 }
 0x2a0   : > { %v623_v61 = vpop.permute.xlu0 %622 }
 0x2a1   : > { %v624_v62 = vrot.slane %v623_v61, 6 }
 0x2a3   : > { %v625_v63 = vsel %vm276_vm6, %v624_v62, %v623_v61  ;;  %vm930_vm6 = vcmask 257024  }
 0x2a4   : > { %627 = vst.msk [vmem:[#allocation3] sm:$0x3f] %vm1433_vm7, %v625_v63 }
 0x2ab   : > { %v628_v0 = vld [vmem:[#allocation3] sm:$0x3f] }
 0x2ac   : > { %v637_v1 = vrot.slane %v628_v0, %v1416_v6  ;;  %1038 = vst.sshfl [vmem:[#allocation4] sm:$0xf pattern:$0x76325410] %v628_v0  ;;  %v630_v2 = vcombine.high %v628_v0, %v628_v0  ;;  %v649_v16 = vcombine.low %v628_v0, %v628_v0 }
 0x2ae   : > { %707 = vrot.lane.b32.xlu0 %v637_v1, %s1272_s15  ;;  %741 = vrot.lane.b32.xlu1 %v637_v1, %s1270_s12  ;;  %v644_v5 = vrot.slane %v630_v2, %v1416_v6  ;;  %v656_v10 = vrot.slane %v649_v16, %v1416_v6  ;;  %v764_v6 = vld [vmem:[%s1635_s3] sm:$0xf] }
 0x2b0   : > { %648 = vst.msk [vmem:[#allocation4 + $0x8] sm:$0x3] %vm308_vm8, %v644_v5 }
 0x2b2   : > { %731 = vrot.lane.b32.xlu0 %v637_v1, %s1274_s26  ;;  %693 = vrot.lane.b32.xlu1 %v637_v1, %s1269_s11 }
 0x2b6   : > { %659 = vrot.lane.b32.xlu0 %v637_v1, %s1276_s7  ;;  %717 = vrot.lane.b32.xlu1 %v637_v1, %s1271_s14 }
 0x2ba   : > { %669 = vrot.lane.b32.xlu1 %v637_v1, %s1273_s25  ;;  %743 = vrot.lane.b32.xlu0 %v644_v5, %s1270_s12 }
 0x2be   : > { %705 = vrot.lane.b32.xlu1 %v656_v10, %s1272_s15  ;;  %695 = vrot.lane.b32.xlu0 %v644_v5, %s1269_s11 }
 0x2c2   : > { %729 = vrot.lane.b32.xlu1 %v656_v10, %s1274_s26  ;;  %719 = vrot.lane.b32.xlu0 %v644_v5, %s1271_s14  ;;  %s240_s26 = scalar_lea.vmem [#allocation8], %s1084_s16  ;;  %s933_s16 = scalar_lea.sflag [#allocation7], %s1397_s13 }
 0x2c6   : > { %657 = vrot.lane.b32.xlu1 %v656_v10, %s1276_s7  ;;  %671 = vrot.lane.b32.xlu0 %v644_v5, %s1273_s25  ;;  %s1085_s7 = smul.u32 192, %s1332_s22  ;;  %s1280_s22 = smov [#allocation8]  }
 0x2c7   : > { %s1203_s6 = sshll.u32 %s1280_s22, 4  ;;  %s1204_s6 = int_to_ptr.vmem [resolvable:$false] %s1203_s6 }
 0x2c8   : > { %s945_s17 = scalar_lea.hbm %s1637_s5, %s1085_s7  ;;  %s1205_s28 = scalar_lea.vmem %s1204_s6, 384 }
 0x2ca   : > { %681 = vrot.lane.b32.xlu1 %v656_v10, %s1278_s8  ;;  %683 = vrot.lane.b32.xlu0 %v637_v1, %s1278_s8  ;;  %s947_s8 = sshll.u32 %s240_s26, 4  ;;  %s948_s8 = int_to_ptr.vmem [resolvable:$true] %s947_s8 }
 0x2cb   : > { %s1199_s23 = scalar_lea.vmem %s948_s8, 192  ;;  %p1206_p1 = scmp.lt.s32.totalorder %s948_s8, %s1204_s6 }
 0x2cc   : > { %p1200_p11 = scmp.ne.s32.totalorder %s948_s8, %s1199_s23  ;;  %p1207_p3 = scmp.lt.s32.totalorder %s1205_s28, %s1199_s23 }
 0x2ce   : > { %767 = vperm.xlu1 %1147, %v764_v6   ;;  %p1201_p13 = pnand %p1200_p11, %p1649_p12  ;;  %p1208_p8 = por %p1207_p3, %p1206_p1 }
 0x2d0   : > { %p1202_p0 = pneg %p1201_p13 }
 0x2d2   : > { %p1209_p10 = pnand %p1208_p8, %p1202_p0 }
 0x320   : > { %v708_v12 = vpop.permute.xlu0 %707  ;;  %v742_v13 = vpop.permute.xlu1 %741 }
 0x321   : > { %716 = vst.msk [vmem:[#allocation4 + $0x20] sm:$0xc] %vm331_vm10, %v708_v12  ;;  %v745_v21 = vrot.slane %v742_v13, 4  ;;  %v710_v28 = vrot.slane %v708_v12, 4 }
 0x324   : > { %v732_v14 = vpop.permute.xlu0 %731  ;;  %v694_v15 = vpop.permute.xlu1 %693 }
 0x325   : > { %740 = vst.msk [vmem:[#allocation4 + $0x2c] sm:$0xc] %vm331_vm10, %v732_v14  ;;  %v697_v29 = vrot.slane %v694_v15, 4  ;;  %v734_v41 = vrot.slane %v732_v14, 4  ;;  %v753_v14 = vld [vmem:[%s1634_s2] sm:$0x3] }
 0x328   : > { %v660_v17 = vpop.permute.xlu0 %659  ;;  %v718_v18 = vpop.permute.xlu1 %717 }
 0x329   : > { %668 = vst.msk [vmem:[#allocation4 + $0x8] sm:$0xc] %vm331_vm10, %v660_v17  ;;  %v721_v3 = vrot.slane %v718_v18, 4  ;;  %v662_v48 = vrot.slane %v660_v17, 4 }
 0x32c   : > { %v670_v19 = vpop.permute.xlu1 %669  ;;  %v744_v20 = vpop.permute.xlu0 %743 }
 0x32d   : > { %v746_v22 = vrot.slane %v744_v20, 4  ;;  %752 = vst.msk [vmem:[#allocation4 + $0x38] sm:$0x3] %vm308_vm8, %v744_v20  ;;  %v673_v49 = vrot.slane %v670_v19, 4 }
 0x32f   : > { %v747_v24 = vsel %vm324_vm11, %v745_v21, %v746_v22 }
 0x330   : > { %v748_v25 = vsel %vm418_vm12, %v742_v13, %v747_v24  ;;  %v706_v26 = vpop.permute.xlu1 %705  ;;  %v696_v27 = vpop.permute.xlu0 %695 }
 0x331   : > { %751 = vst [vmem:[#allocation4 + $0x30] sm:$0x33] %v748_v25  ;;  %v709_v30 = vrot.slane %v706_v26, 4  ;;  %v698_v31 = vrot.slane %v696_v27, 4  ;;  %704 = vst.msk [vmem:[#allocation4 + $0x20] sm:$0x3] %vm308_vm8, %v696_v27 }
 0x333   : > { %v711_v33 = vsel %vm324_vm11, %v709_v30, %v710_v28  ;;  %v699_v34 = vsel %vm324_vm11, %v697_v29, %v698_v31 }
 0x334   : > { %v712_v35 = vsel %vm379_vm14, %v706_v26, %v711_v33  ;;  %v700_v36 = vsel %vm366_vm13, %v694_v15, %v699_v34  ;;  %v730_v37 = vpop.permute.xlu1 %729  ;;  %v720_v38 = vpop.permute.xlu0 %719  ;;  %v1160_v39 = vld [vmem:[#allocation4 + $0x38] ss:$0 sps:$4 sm:$0x33]  }
 0x335   : > { %715 = vst [vmem:[#allocation4 + $0x18] sm:$0xcc] %v712_v35  ;;  %703 = vst [vmem:[#allocation4 + $0x18] sm:$0x33] %v700_v36  ;;  %v733_v43 = vrot.slane %v730_v37, 4  ;;  %v722_v44 = vrot.slane %v720_v38, 4 }
 0x336   : > { %728 = vst.msk [vmem:[#allocation4 + $0x2c] sm:$0x3] %vm308_vm8, %v720_v38  ;;  %v820_v45 = vsel %vm485_vm0, %v1160_v39, 0 }
 0x337   : > { %v735_v46 = vsel %vm324_vm11, %v733_v43, %v734_v41  ;;  %v723_v47 = vsel %vm324_vm11, %v721_v3, %v722_v44  ;;  %1073 = vmatpush3.bf16.msra.mxu1 %v820_v45 }
 0x338   : > { %v736_v50 = vsel %vm405_vm1, %v730_v37, %v735_v46  ;;  %v724_v51 = vsel %vm392_vm15, %v718_v18, %v723_v47  ;;  %v658_v52 = vpop.permute.xlu1 %657  ;;  %v672_v53 = vpop.permute.xlu0 %671  ;;  %v762_v54 = vld [vmem:[#allocation4 + $0x30] sm:$0x33]  ;;  %1074 = vmatprep.subr.bf16.mxu1 %v1275_v23 }
 0x339   : > { %739 = vst [vmem:[#allocation4 + $0x24] sm:$0xcc] %v736_v50  ;;  %727 = vst [vmem:[#allocation4 + $0x24] sm:$0x33] %v724_v51  ;;  %v661_v55 = vrot.slane %v658_v52, 4  ;;  %v674_v56 = vrot.slane %v672_v53, 4  ;;  %v1046_v57 = vcombine.high %v762_v54, %v762_v54  ;;  %v1045_v58 = vcombine.low %v762_v54, %v762_v54 }
 0x33a   : > { %680 = vst.msk [vmem:[#allocation4 + $0x14] sm:$0x3] %vm308_vm8, %v672_v53 }
 0x33b   : > { %v663_v59 = vsel %vm324_vm11, %v661_v55, %v662_v48  ;;  %v675_v60 = vsel %vm324_vm11, %v673_v49, %v674_v56  ;;  %1048 = vmatprep.subr.msk.bf16.mxu0 %vm485_vm0, %v1046_v57  ;;  %v814_v61 = vsel %vm485_vm0, %v1045_v58, 0 }
 0x33c   : > { %v664_v62 = vsel %vm326_vm3, %v658_v52, %v663_v59  ;;  %v676_v63 = vsel %vm340_vm2, %v670_v19, %v675_v60  ;;  %v682_v0 = vpop.permute.xlu1 %681  ;;  %833 = vmatpush1.bf16.msra.mxu0 %v814_v61  ;;  %v684_v1 = vpop.permute.xlu0 %683 }
 0x33d   : > { %v1163_v2 = vld [vmem:[#allocation4 + $0x20] ss:$12 sps:$4 sm:$0xff]   ;;  %667 = vst [vmem:[#allocation4] sm:$0xcc] %v664_v62  ;;  %679 = vst [vmem:[#allocation4 + $0xc] sm:$0x33] %v676_v63 }
 0x33e   : > { %v685_v5 = vrot.slane %v682_v0, 4  ;;  %v686_v16 = vrot.slane %v684_v1, 4  ;;  %692 = vst.msk [vmem:[#allocation4 + $0x14] sm:$0xc] %vm331_vm10, %v684_v1  ;;  %1075 = vmatpush3.bf16.msra.mxu1 %v1163_v2 }
 0x33f   : > { %1076 = vmatprep.subr.bf16.mxu1 %v1275_v23  ;;  %v1023_v23 = vld [vmem:[%s1636_s4 + $0x1] ss:$2 sm:$0x7] }
 0x340   : > { %v687_v10 = vsel %vm324_vm11, %v685_v5, %v686_v16  ;;  %v1164_v11 = vld [vmem:[#allocation4 + $0x18] ss:$12 sps:$4 sm:$0xff]   ;;  %v1166_v12 = vld [vmem:[#allocation4 + $0x1c] ss:$12 sps:$4 sm:$0xff]   ;;  %v915_v18 = vrot.slane %v1023_v23, %v590_v32  ;;  %v907_v25 = vrot.slane %v1023_v23, %v582_v40  ;;  %v911_v30 = vrot.slane %v1023_v23, %v586_v42 }
 0x341   : > { %v688_v6 = vsel %vm353_vm4, %v682_v0, %v687_v10  ;;  %834 = vmatprep.subr.bf16.mxu0 %v1166_v12 }
 0x342   : > { %691 = vst [vmem:[#allocation4 + $0xc] sm:$0xcc] %v688_v6  ;;  %835 = vmatpush1.bf16.msra.mxu0 %v1164_v11 }
 0x345   : > { %v1167_v13 = vld [vmem:[#allocation4 + $0x8] ss:$12 sps:$4 sm:$0xff]  }
 0x346   : > { %1077 = vmatpush3.bf16.msra.mxu1 %v1167_v13 }
 0x349   : > { %v1168_v15 = vld [vmem:[#allocation4] ss:$12 sps:$4 sm:$0xff]   ;;  %v1170_v17 = vld [vmem:[#allocation4 + $0x4] ss:$12 sps:$4 sm:$0xff]   ;;  %1079 = vmatmul.mubr.msk.bf16.vlgmr.msra.gmra.mxu1 %vm481_vm5, %v753_v14  ;;  %v768_v20 = vpop.permute.xlu1 %767 }
 0x34a   : > { %836 = vmatprep.subr.bf16.mxu0 %v1170_v17 }
 0x34b   : > { %837 = vmatpush1.bf16.msra.mxu0 %v1168_v15 }
 0x34e   : > { %1049 = vmatmul.mubr.msk.bf16.vlgmr.msra.gmra.mxu0 %vm481_vm5, %v753_v14 }
 0x409   : > { %v897_v19 = vpop.f32.mrf.mxu1 }
 0x40a   : > { %v898_v21 = vadd.f32 %v897_v19, %v768_v20 }
 0x40b   : > { %v1080_v22 = vpop.f32.mrf.mxu1 }
 0x40c   : > { %v921_v24 = vmul.f32 %v915_v18, %v898_v21 }
 0x40d   : > { %v900_v26 = vpop.f32.mrf.mxu1 }
 0x40e   : > { %v924_v27 = vadd.f32 %v921_v24, %v1420_v8  ;;  %v856_v28 = vpop.f32.mrf.mxu0 }
 0x40f   : > { %v857_v29 = vadd.f32 %v856_v28, %v768_v20  ;;  %v1081_v31 = vpop.f32.mrf.mxu1 }
 0x410   : > { %v858_v32 = vpop.f32.mrf.mxu0  ;;  %931 = vst.msk [vmem:[%s240_s26 + $0x8] sm:$0xf] %vm930_vm6, %v924_v27 }
 0x411   : > { %v919_v33 = vmul.f32 %v907_v25, %v857_v29  ;;  %v859_v34 = vadd.f32 %v858_v32, %v768_v20 }
 0x412   : > { %v860_v35 = vpop.f32.mrf.mxu0 }
 0x413   : > { %v920_v40 = vmul.f32 %v911_v30, %v859_v34  ;;  %v922_v8 = vadd.f32 %v919_v33, %v1418_v7 }
 0x414   : > { %v861_v36 = vpop.f32.mrf.mxu0 }
 0x415   : > { %v923_v37 = vadd.f32 %v920_v40, %v1424_v9 }
 0x417   : > { %v927_v4 = vcombine.low %v922_v8, %v923_v37 }
 0x419   : > { %929 = vst [vmem:[%s240_s26] sm:$0xff] %v927_v4 }
 0x41a   : > { %1212 = shalt.err (!%p1209_p10)
}
 0x41b   : > { %s1213_s12 = scalar_lea.hbm %s945_s17, 192  ;;  %s1217_s14 = scalar_lea.hbm %s1637_s5, 384 }
 0x41c   : > { %p1214_p2 = scmp.ne.s32.totalorder %s945_s17, %s1213_s12  ;;  %p1218_p7 = scmp.lt.s32.totalorder %s945_s17, %s1637_s5 }
 0x41d   : > { %p1219_p5 = scmp.lt.s32.totalorder %s1217_s14, %s1213_s12 }
 0x41e   : > { %p1215_p4 = pnand %p1214_p2, %p1649_p12 }
 0x41f   : > { %p1220_p6 = por %p1219_p5, %p1218_p7 }
 0x420   : > { %p1216_p9 = pneg %p1215_p4 }
 0x422   : > { %p1221_p11 = pnand %p1220_p6, %p1216_p9 }
 0x424   : > { %1224 = shalt.err (!%p1221_p11)
}
 0x425   : > { %1088 = dma.vmem_to_hbm [thread:$0]  (%p1649_p12), %s948_s8, 192, %s945_s17, %s933_s16  }
 0x426 PF: > { %s959_s26 = sand.u32 1, %s1251_s18   ;;  %p1650_p13 = scmp.ne.s32.totalorder %s1642_s30, 0 }
 0x427   : > { %p1651_p0 = scmp.ge.s32.totalorder %s1263_s21, 2  ;;  %s960_s7 = scalar_lea.sflag [#allocation7], %s959_s26 }
 0x429   : > { %p1095_p1 = pnand %p1651_p0, %p1650_p13 }
 0x42b   : > { %p1096_p3 = pneg %p1095_p1 }
 0x42d   : > { %1246 = dma.done.wait (%p1096_p3), %s960_s7, 192  }
 0x42e   : > { %1248 = vsyncadd (%p1096_p3), %s960_s7, 4294967104  ;;  %p18_p8 = scmp.ge.s32.totalorder %s1336_s24, 4   ;;  %s1652_s18 = smov %s1255_s19 }
 0x42f   : > { %s1653_s19 = smov %s1259_s20  ;;  %s1654_s20 = smov %s1348_s27 }
 0x430   : > { %s1655_s21 = smov %s1336_s24  ;;  %20 = sbr.rel (!%p18_p8) target bundleno = 5 (0x5), region = 86 }
 0x435   :  { %965 = vsyncpa [#allocation6], 1 }
 0x436   :  { %967 = vsyncpa [#allocation6 + $0x1], 1 }
 0x437   :  { %968 = vsyncpa [#allocation7], 1 }
 0x438   :  { %970 = vsyncpa [#allocation7 + $0x1], 1 }

</bundles_post_ra>
